<compile_context>
chip_gen: v7x
topology: tpu7x:2x2x1
jax: 0.10.0
libtpu: 0.0.40
codegen_flags: <defaults>
</compile_context>

<pallas_src>
import math

import jax
import jax.numpy as jnp
from jax.experimental import pallas as pl
from jax.experimental.pallas import tpu as pltpu


def _scaling_kernel(x_ref, s_ref, o_ref):
    # Upcast to f32, multiply by the f32 scale row (broadcasts over rows), cast back.
    x = x_ref[...].astype(jnp.float32)
    o_ref[...] = (x * s_ref[...]).astype(o_ref.dtype)


def _chip_vmem_capacity_bytes() -> int:
    try:
        info = pltpu.get_tpu_info()
        cap = int(getattr(info, "vmem_capacity_bytes", 64 << 20))
        return cap if cap > 0 else (64 << 20)
    except Exception:
        return 64 << 20


def scaling_layer(x: jax.Array, scale: jax.Array, *,
                  target_block_bytes: int | None = None) -> jax.Array:
    """Applies y = x * scale along the last dim via a Pallas TPU kernel.

    x:     (..., dim)   any float dtype
    scale: (dim,)       learnable diagonal scale (kept in f32 for the multiply)
    """
    orig_shape = x.shape
    dim = orig_shape[-1]
    assert scale.shape == (dim,), f"scale must be ({dim},), got {scale.shape}"

    # ---- chip-aware budgets -------------------------------------------------
    vmem_cap = _chip_vmem_capacity_bytes()
    vmem_headroom = max(32 << 20, int(vmem_cap * 0.75))      # never the full physical VMEM
    if target_block_bytes is None:
        # 8 MiB blocks on 128 MiB-VMEM chips (v5e/v6e), 4 MiB on v7x (64 MiB VMEM).
        target_block_bytes = (8 << 20) if vmem_cap >= (96 << 20) else (4 << 20)

    # ---- flatten + lane-packing for narrow / non-lane-dense feature dims ----
    x2d = x.reshape(-1, dim)
    batch = x2d.shape[0]
    scale_f32 = scale.astype(jnp.float32)

    pack_g = 1
    if dim % 128 != 0:
        g = 128 // math.gcd(dim, 128)
        if g > 1 and batch % g == 0 and batch // g >= 1:
            pack_g = g
    if pack_g > 1:
        dim_p = pack_g * dim
        batch_p = batch // pack_g
        x2d = x2d.reshape(batch_p, dim_p)
        scale2d = jnp.tile(scale_f32, pack_g).reshape(1, dim_p)
    else:
        dim_p = dim
        batch_p = batch
        scale2d = scale_f32.reshape(1, dim_p)

    itemsize = jnp.dtype(x.dtype).itemsize
    # Sublane packing: 8 rows for 4-byte, 16 for 2-byte, 32 for 1-byte dtypes.
    sub = max(8, 32 // itemsize)

    # ---- block selection: prefer full-dim columns, shrink rows first --------
    full_dim_min_bytes = 4 * sub * dim_p * itemsize + 2 * dim_p * 4   # 2x(in)+2x(out)+scale
    split_cols = full_dim_min_bytes > vmem_headroom

    if not split_cols:
        block_cols = dim_p
    else:
        # Last resort: split the feature dim on a large multiple of 128.
        max_cols = max(128, (target_block_bytes // (sub * itemsize)) // 128 * 128)
        block_cols = min(dim_p, max_cols)

    rows = max(sub, (target_block_bytes // max(1, block_cols * itemsize)) // sub * sub)
    block_rows = batch_p if rows >= batch_p else rows

    n_rows = pl.cdiv(batch_p, block_rows)
    n_cols = pl.cdiv(dim_p, block_cols)

    # Guarantee >= 2 grid steps on a parallel axis (v7x has 2 TensorCores; also gives the
    # pipeline something to overlap). Only possible if the batch spans more than one
    # sublane tile.
    if n_rows * n_cols == 1 and batch_p > sub:
        half = (batch_p + 1) // 2
        block_rows = ((half + sub - 1) // sub) * sub
        n_rows = pl.cdiv(batch_p, block_rows)

    # ---- specs / grid --------------------------------------------------------
    if split_cols:
        # Column index on the OUTER axis so the scale block stays resident across the
        # inner row sweep.
        grid = (n_cols, n_rows)
        x_spec = pl.BlockSpec((block_rows, block_cols), lambda jc, ir: (ir, jc))
        s_spec = pl.BlockSpec((1, block_cols), lambda jc, ir: (0, jc))
        o_spec = pl.BlockSpec((block_rows, block_cols), lambda jc, ir: (ir, jc))
    else:
        grid = (n_rows, n_cols)
        x_spec = pl.BlockSpec((block_rows, block_cols), lambda i, j: (i, j))
        s_spec = pl.BlockSpec((1, block_cols), lambda i, j: (0, j))
        o_spec = pl.BlockSpec((block_rows, block_cols), lambda i, j: (i, j))

    # VMEM budget: double-buffered input + output blocks plus the (f32) scale row.
    block_bytes = block_rows * block_cols * itemsize
    needed = 4 * block_bytes + 2 * block_cols * 4
    vmem_limit = int(min(max(32 << 20, needed * 1.25), vmem_headroom))

    total_bytes = batch_p * dim_p * itemsize
    cost = pl.CostEstimate(
        flops=batch_p * dim_p,
        transcendentals=0,
        bytes_accessed=2 * total_bytes + dim_p * 4,
    )

    out = pl.pallas_call(
        _scaling_kernel,
        out_shape=jax.ShapeDtypeStruct((batch_p, dim_p), x.dtype),
        grid_spec=pltpu.PrefetchScalarGridSpec(
            num_scalar_prefetch=0,
            grid=grid,
            in_specs=[x_spec, s_spec],
            out_specs=o_spec,
        ),
        compiler_params=pltpu.CompilerParams(
            dimension_semantics=("parallel", "parallel"),
            vmem_limit_bytes=vmem_limit,
        ),
        cost_estimate=cost,
    )(x2d, scale2d)

    return out.reshape(orig_shape)


if __name__ == "__main__":
    key = jax.random.PRNGKey(0)
    k1, k2, k3, k4 = jax.random.split(key, 4)

    # --- primary check: f32, lane-dense feature dim (batch=8, dim=128) ---
    batch, dim = 8, 128
    # nn.Parameter(torch.ones(dim)) -> ones; perturb deterministically for a non-trivial test.
    scale = jnp.ones((dim,), jnp.float32) + 0.1 * jax.random.normal(k1, (dim,), jnp.float32)
    x = jax.random.normal(k2, (batch, dim), jnp.float32)
    y = jax.block_until_ready(scaling_layer(x, scale))
    y_ref = x * scale[None, :]
    assert jnp.allclose(y, y_ref, atol=1e-6, rtol=1e-6), "f32 mismatch vs reference"

    # --- narrow-feature check: dim=32 < 128 exercises the lane-packing path ---
    b3, d3 = 16, 32  # g = 128/gcd(32,128) = 4; 16 % 4 == 0 -> packed to (4, 128)
    scale3 = jnp.ones((d3,), jnp.float32) + 0.05 * jax.random.normal(k3, (d3,), jnp.float32)
    x3 = jax.random.normal(k4, (b3, d3), jnp.float32)
    y3 = jax.block_until_ready(scaling_layer(x3, scale3))
    assert jnp.allclose(y3, x3 * scale3[None, :], atol=1e-6, rtol=1e-6), "packed-path mismatch"

    # --- bf16, 3-D input, non-power-of-two flattened batch ---
    b4, s4, d4 = 2, 10, 256
    scale4 = jnp.ones((d4,), jnp.float32) + 0.05 * jax.random.normal(k1, (d4,), jnp.float32)
    x4 = jax.random.normal(k2, (b4, s4, d4), jnp.float32).astype(jnp.bfloat16)
    y4 = jax.block_until_ready(scaling_layer(x4, scale4))
    y4_ref = (x4.astype(jnp.float32) * scale4[None, None, :]).astype(jnp.bfloat16)
    assert jnp.allclose(y4.astype(jnp.float32), y4_ref.astype(jnp.float32),
                        atol=1e-2, rtol=1e-2), "bf16 mismatch vs reference"

    print("KERNEL_OK")
</pallas_src>

<mosaic_0001>
module attributes {stable_mosaic.version = 11 : i64} {
  func.func @_scaling_kernel(%arg0: i32, %arg1: i32, %arg2: memref<8x128xf32, #tpu.memory_space<vmem>>, %arg3: memref<1x128xf32, #tpu.memory_space<vmem>>, %arg4: memref<8x128xf32, #tpu.memory_space<vmem>>) attributes {dimension_semantics = [#tpu.dimension_semantics<parallel>, #tpu.dimension_semantics<parallel>], iteration_bounds = array<i64: 1, 1>, scalar_prefetch = 0 : i64, scratch_operands = 0 : i64, tpu.core_type = #tpu.core_type<tc>, window_params = [{transform_indices = @transform_0, window_bounds = array<i64: 8, 128>}, {transform_indices = @transform_1, window_bounds = array<i64: 1, 128>}, {transform_indices = @transform_2, window_bounds = array<i64: 8, 128>}]} {
    %c0 = arith.constant 0 : index
    %c0_0 = arith.constant 0 : index
    %0 = vector.load %arg2[%c0, %c0_0] : memref<8x128xf32, #tpu.memory_space<vmem>>, vector<8x128xf32>
    %c0_1 = arith.constant 0 : index
    %c0_2 = arith.constant 0 : index
    %1 = vector.load %arg3[%c0_1, %c0_2] : memref<1x128xf32, #tpu.memory_space<vmem>>, vector<1x128xf32>
    %2 = vector.broadcast %1 : vector<1x128xf32> to vector<8x128xf32>
    %3 = arith.mulf %0, %2 : vector<8x128xf32>
    %c0_3 = arith.constant 0 : index
    %c0_4 = arith.constant 0 : index
    %4 = vector.load %arg4[%c0_3, %c0_4] : memref<8x128xf32, #tpu.memory_space<vmem>>, vector<8x128xf32>
    tpu.vector_store %arg4[%c0_3, %c0_4], %3 {strides = array<i32>} : memref<8x128xf32, #tpu.memory_space<vmem>>, vector<8x128xf32>,
    return
  }
  func.func @transform_0(%arg0: i32, %arg1: i32) -> (i32, i32) {
    %c0_i32 = arith.constant 0 : i32
    return %arg0, %arg1 : i32, i32
  }
  func.func @transform_1(%arg0: i32, %arg1: i32) -> (i32, i32) {
    %c0_i32 = arith.constant 0 : i32
    %c0_i32_0 = arith.constant 0 : i32
    return %c0_i32, %arg1 : i32, i32
  }
  func.func @transform_2(%arg0: i32, %arg1: i32) -> (i32, i32) {
    %c0_i32 = arith.constant 0 : i32
    return %arg0, %arg1 : i32, i32
  }
}

</mosaic_0001>

<bundles_post_ra>
// kernel: tpu_custom_call.1
= control target key start
LH: loop header
LB: loop body
LE: loop exit
PB: predicated region body
PF: predicated region fallthrough
CT: control target
= control target key end

     0   :  { %7 = vsyncpa [#allocation3], 0  ;;  %s144_s0 = inlined_call_operand.hbm [shape: f32[8,128], index: 0, kind: input, shape index: {}]   ;;  %s145_s1 = inlined_call_operand.vmem [shape: f32[1,128], index: 1, kind: input, shape index: {}]   ;;  %s146_s2 = inlined_call_operand.hbm [shape: f32[8,128], index: 2, kind: output, shape index: {}]  }
   0x1   :  { %8 = vsyncpa [#allocation4], 0  ;;  %s100_s9 = smov [#allocation2]   ;;  %s52_s13 = scalar_lea.hbm %s144_s0, 128 }
   0x2   :  { %s15_s10 = sshll.u32 %s100_s9, 4  ;;  %p53_p0 = scmp.ne.s32.totalorder %s144_s0, %s52_s13  ;;  %s16_s10 = int_to_ptr.vmem [resolvable:$true] %s15_s10 }
   0x3   :  { %p56_p1 = scmp.lt.u32.totalorder %s52_s13, %s144_s0 }
   0x5   :  { %p58_p2 = pnand %p56_p1, %p53_p0 }
   0x7   :  { %61 = shalt.err (!%p58_p2)
}
   0x8   :  { %s62_s18 = scalar_lea.vmem %s16_s10, 128  ;;  %p67_p4 = scmp.lt.s32.totalorder %s16_s10, %s16_s10 }
   0x9   :  { %p63_p3 = scmp.ne.s32.totalorder %s16_s10, %s62_s18  ;;  %p68_p5 = scmp.lt.s32.totalorder %s62_s18, %s62_s18 }
   0xb   :  { %p69_p6 = por %p68_p5, %p67_p4 }
   0xd   :  { %p70_p7 = pnand %p69_p6, %p63_p3 }
   0xf   :  { %73 = shalt.err (!%p70_p7)
}
  0x10   :  { %18 = dma.hbm_to_vmem [thread:$0]  %s144_s0, 128, %s16_s10, [#allocation3]  }
  0x11   :  { %96 = dma.done.wait [#allocation3], 128  }
  0x12   :  { %97 = vsyncadd [#allocation3], 4294967168  ;;  %s101_s21 = smov [#allocation5]   ;;  %v24_v0 = vld [vmem:[#allocation2] sm:$0xff] }
  0x13   :  { %s40_s22 = sshll.u32 %s101_s21, 4  ;;  %v49_v1 = vld [vmem:[%s145_s1] ss:$0 sm:$0xff]  ;;  %s41_s22 = int_to_ptr.vmem [resolvable:$true] %s40_s22 }
  0x14   :  { %v32_v2 = vmul.f32 %v49_v1, %v24_v0  ;;  %s74_s25 = scalar_lea.vmem %s41_s22, 128  ;;  %p79_p9 = scmp.lt.s32.totalorder %s41_s22, %s41_s22 }
  0x15   :  { %p75_p8 = scmp.ne.s32.totalorder %s41_s22, %s74_s25  ;;  %p80_p10 = scmp.lt.s32.totalorder %s74_s25, %s74_s25 }
  0x16   :  { %33 = vst [vmem:[#allocation5] sm:$0xff] %v32_v2 }
  0x17   :  { %p81_p11 = por %p80_p10, %p79_p9 }
  0x19   :  { %p82_p12 = pnand %p81_p11, %p75_p8 }
  0x1b   :  { %85 = shalt.err (!%p82_p12)
}
  0x1c   :  { %s86_s27 = scalar_lea.hbm %s146_s2, 128 }
  0x1d   :  { %p87_p13 = scmp.ne.s32.totalorder %s146_s2, %s86_s27  ;;  %p90_p0 = scmp.lt.u32.totalorder %s86_s27, %s146_s2 }
  0x1f   :  { %p92_p1 = pnand %p90_p0, %p87_p13 }
  0x21   :  { %95 = shalt.err (!%p92_p1)
}
  0x22   :  { %43 = dma.vmem_to_hbm [thread:$0]  %s41_s22, 128, %s146_s2, [#allocation4]  }
  0x23   :  { %98 = dma.done.wait [#allocation4], 128  }
  0x24   :  { %99 = vsyncadd [#allocation4], 4294967168 }
  0x25   :  { %47 = vsyncpa [#allocation3], 1 }
  0x26   :  { %48 = vsyncpa [#allocation4], 1 }

</bundles_post_ra>
